<compile_context>
chip_gen: v6e
topology: v6e:2x2x1
jax: 0.10.0
libtpu: 0.0.40
codegen_flags: <defaults>
</compile_context>

<pallas_src>
import jax
import jax.numpy as jnp
from jax.experimental import pallas as pl
from jax.experimental.pallas import tpu as pltpu


def _blend_kernel(swap_ref, mask_ref, att_ref, out_ref):
    s = swap_ref[...]
    m = mask_ref[...]
    a = att_ref[...]
    # Equivalent to s*m + a*(1-m); one fewer multiply, explicit store cast.
    out_ref[...] = (a + (s - a) * m).astype(out_ref.dtype)


_VMEM_LIMIT = 40 << 20    # safe on v5e/v6e (128 MiB phys) and v7x (64 MiB phys)
_PIPE_BUDGET = 24 << 20   # target double-buffered pipeline footprint (all streams)
_PACK = 32                # sublane multiple covering f32 / bf16 / int8 / fp8 packing
_MIN_PARALLEL = 4         # >= 2 grid points per TensorCore on v7x (2 TCs/chip)


def _pick_lanes(hw):
    for lanes in (1024, 512, 256, 128):
        if hw % lanes == 0:
            return lanes
    return None


def _round_down(x, m):
    return max(m, (x // m) * m)


def _pick_row_tile(rows, n_parallel, bytes_per_row,
                   pipe_budget=_PIPE_BUDGET, min_parallel=_MIN_PARALLEL):
    """Largest row tile s.t. the 2x-buffered streams fit the VMEM budget and the
    parallel grid keeps both v7x TensorCores fed."""
    tr = max(1, pipe_budget // (2 * bytes_per_row))
    if n_parallel < min_parallel:
        want_tiles = -(-min_parallel // n_parallel)          # ceil
        tr = min(tr, max(1, rows // want_tiles))
    if tr >= rows:
        return rows
    tr = _round_down(tr, _PACK) if tr >= _PACK else _round_down(tr, 8)
    return min(tr, rows)


def _compiler_params(dims):
    return pltpu.CompilerParams(dimension_semantics=dims,
                                vmem_limit_bytes=_VMEM_LIMIT)


def blend_forward(swap, mask, att_img):
    """Pallas TPU implementation of BlendModule.forward(swap, mask, att_img)."""
    n, c, h, w = swap.shape
    assert att_img.shape == swap.shape
    assert mask.shape in ((n, 1, h, w), (n, c, h, w))
    mc = mask.shape[1]  # 1 (broadcast over channels) or c

    isz = jnp.dtype(swap.dtype).itemsize
    msz = jnp.dtype(mask.dtype).itemsize
    hw = h * w
    lanes = _pick_lanes(hw)

    if lanes is None:
        # Ragged H*W: full-extent last-two-dim blocks, one image per grid step.
        # No padded HBM copies (the old jnp.pad path doubled HBM traffic).
        # TODO(synk): tile hw with a masked tail if ragged images ever get
        # large enough to pressure VMEM; realistic face crops never hit this.
        swap3 = swap.reshape(n, c, hw)
        att3 = att_img.reshape(n, c, hw)
        mask3 = mask.reshape(n, mc, hw)
        img_spec = pl.BlockSpec((1, c, hw), lambda ni: (ni, 0, 0))
        mask_spec = pl.BlockSpec((1, mc, hw), lambda ni: (ni, 0, 0))
        out3 = pl.pallas_call(
            _blend_kernel,
            out_shape=jax.ShapeDtypeStruct((n, c, hw), swap.dtype),
            grid=(n,),
            in_specs=[img_spec, mask_spec, img_spec],
            out_specs=img_spec,
            compiler_params=_compiler_params(("parallel",)),
        )(swap3, mask3, att3)
        return out3.reshape(n, c, h, w)

    rows = hw // lanes

    if mc == c:
        # Per-channel mask: mask aligns elementwise with the images, so flatten
        # everything into one lane-dense 2-D slab -> fewest, largest grid steps.
        total_rows = n * c * rows
        bytes_per_row = lanes * (3 * isz + msz)
        tr = _pick_row_tile(total_rows, 1, bytes_per_row)
        spec = pl.BlockSpec((tr, lanes), lambda i: (i, 0))
        out2 = pl.pallas_call(
            _blend_kernel,
            out_shape=jax.ShapeDtypeStruct((total_rows, lanes), swap.dtype),
            grid=(pl.cdiv(total_rows, tr),),
            in_specs=[spec, spec, spec],
            out_specs=spec,
            compiler_params=_compiler_params(("parallel",)),
        )(swap.reshape(total_rows, lanes),
          mask.reshape(total_rows, lanes),
          att_img.reshape(total_rows, lanes))
        return out2.reshape(n, c, h, w)

    # Broadcast mask (mc == 1).
    swap4 = swap.reshape(n, c, rows, lanes)
    att4 = att_img.reshape(n, c, rows, lanes)
    mask4 = mask.reshape(n, 1, rows, lanes)

    fused_bytes_per_row = lanes * (3 * c * isz + msz)
    if 2 * min(rows, 8) * fused_bytes_per_row <= _PIPE_BUDGET:
        # Channel-fused blocks: one grid step / one mask fetch covers all C
        # channels -> C-x fewer grid steps, mask HBM traffic divided by C.
        tr = _pick_row_tile(rows, n, fused_bytes_per_row)
        img_spec = pl.BlockSpec((1, c, tr, lanes), lambda ni, ri: (ni, 0, ri, 0))
        mask_spec = pl.BlockSpec((1, 1, tr, lanes), lambda ni, ri: (ni, 0, ri, 0))
        grid = (n, pl.cdiv(rows, tr))
        dims = ("parallel", "parallel")
    else:
        # Safety branch for very large channel counts: channels on an innermost
        # "arbitrary" grid axis; same mask block index across it skips re-fetch.
        bytes_per_row = lanes * (3 * isz + msz)
        tr = _pick_row_tile(rows, n, bytes_per_row)
        img_spec = pl.BlockSpec((1, 1, tr, lanes),
                                lambda ni, ri, ci: (ni, ci, ri, 0))
        mask_spec = pl.BlockSpec((1, 1, tr, lanes),
                                 lambda ni, ri, ci: (ni, 0, ri, 0))
        grid = (n, pl.cdiv(rows, tr), c)
        dims = ("parallel", "parallel", "arbitrary")

    out4 = pl.pallas_call(
        _blend_kernel,
        out_shape=jax.ShapeDtypeStruct((n, c, rows, lanes), swap.dtype),
        grid=grid,
        in_specs=[img_spec, mask_spec, img_spec],
        out_specs=img_spec,
        compiler_params=_compiler_params(dims),
    )(swap4, mask4, att4)
    return out4.reshape(n, c, h, w)


if __name__ == "__main__":
    key = jax.random.PRNGKey(0)
    k1, k2, k3 = jax.random.split(key, 3)

    N, C, H, W = 2, 3, 16, 16
    swap = jax.random.normal(k1, (N, C, H, W), dtype=jnp.float32)
    att_img = jax.random.normal(k2, (N, C, H, W), dtype=jnp.float32)
    mask = jax.nn.sigmoid(jax.random.normal(k3, (N, 1, H, W), dtype=jnp.float32))

    ref = swap * mask + att_img * (1.0 - mask)

    # 1) Broadcast mask (N,1,H,W): channel-fused path.
    out = jax.block_until_ready(blend_forward(swap, mask, att_img))
    assert out.shape == (N, C, H, W)
    assert jnp.allclose(out, ref, atol=1e-5), "mismatch vs reference (mc=1)"

    # 2) Per-channel mask (N,C,H,W): flattened 2-D path.
    mask_full = jnp.broadcast_to(mask, swap.shape)
    out2 = jax.block_until_ready(blend_forward(swap, mask_full, att_img))
    assert jnp.allclose(out2, ref, atol=1e-5), "mismatch vs reference (mc=C)"

    # 3) Ragged H*W (not divisible by 128): full-spatial-block fallback, no pad.
    Hr, Wr = 10, 10
    swap_r = jax.random.normal(k1, (N, C, Hr, Wr), dtype=jnp.float32)
    att_r = jax.random.normal(k2, (N, C, Hr, Wr), dtype=jnp.float32)
    mask_r = jax.nn.sigmoid(jax.random.normal(k3, (N, 1, Hr, Wr), dtype=jnp.float32))
    ref_r = swap_r * mask_r + att_r * (1.0 - mask_r)
    out_r = jax.block_until_ready(blend_forward(swap_r, mask_r, att_r))
    assert jnp.allclose(out_r, ref_r, atol=1e-5), "mismatch vs reference (ragged)"

    # 4) bf16 images with f32 mask: exercises the explicit store cast.
    swap_b = swap.astype(jnp.bfloat16)
    att_b = att_img.astype(jnp.bfloat16)
    out_b = jax.block_until_ready(blend_forward(swap_b, mask, att_b))
    ref_b = (swap_b.astype(jnp.float32) * mask
             + att_b.astype(jnp.float32) * (1.0 - mask))
    assert out_b.dtype == jnp.bfloat16
    assert jnp.allclose(out_b.astype(jnp.float32), ref_b, atol=3e-2), \
        "mismatch vs reference (bf16)"

    print("KERNEL_OK")
</pallas_src>

<mosaic_0001>
module attributes {stable_mosaic.version = 11 : i64} {
  func.func @_blend_kernel(%arg0: i32, %arg1: i32, %arg2: memref<1x3x1x256xf32, #tpu.memory_space<vmem>>, %arg3: memref<1x1x1x256xf32, #tpu.memory_space<vmem>>, %arg4: memref<1x3x1x256xf32, #tpu.memory_space<vmem>>, %arg5: memref<1x3x1x256xf32, #tpu.memory_space<vmem>>) attributes {dimension_semantics = [#tpu.dimension_semantics<parallel>, #tpu.dimension_semantics<parallel>], iteration_bounds = array<i64: 2, 1>, scalar_prefetch = 0 : i64, scratch_operands = 0 : i64, tpu.core_type = #tpu.core_type<tc>, window_params = [{transform_indices = @transform_0, window_bounds = array<i64: 1, 3, 1, 256>}, {transform_indices = @transform_1, window_bounds = array<i64: 1, 1, 1, 256>}, {transform_indices = @transform_2, window_bounds = array<i64: 1, 3, 1, 256>}, {transform_indices = @transform_3, window_bounds = array<i64: 1, 3, 1, 256>}]} {
    %c0 = arith.constant 0 : index
    %c0_0 = arith.constant 0 : index
    %c0_1 = arith.constant 0 : index
    %c0_2 = arith.constant 0 : index
    %0 = vector.load %arg2[%c0, %c0_0, %c0_1, %c0_2] : memref<1x3x1x256xf32, #tpu.memory_space<vmem>>, vector<1x3x1x256xf32>
    %c0_3 = arith.constant 0 : index
    %c0_4 = arith.constant 0 : index
    %c0_5 = arith.constant 0 : index
    %c0_6 = arith.constant 0 : index
    %1 = vector.load %arg3[%c0_3, %c0_4, %c0_5, %c0_6] : memref<1x1x1x256xf32, #tpu.memory_space<vmem>>, vector<1x1x1x256xf32>
    %c0_7 = arith.constant 0 : index
    %c0_8 = arith.constant 0 : index
    %c0_9 = arith.constant 0 : index
    %c0_10 = arith.constant 0 : index
    %2 = vector.load %arg4[%c0_7, %c0_8, %c0_9, %c0_10] : memref<1x3x1x256xf32, #tpu.memory_space<vmem>>, vector<1x3x1x256xf32>
    %3 = arith.subf %0, %2 : vector<1x3x1x256xf32>
    %4 = vector.broadcast %1 : vector<1x1x1x256xf32> to vector<1x3x1x256xf32>
    %5 = arith.mulf %3, %4 : vector<1x3x1x256xf32>
    %6 = arith.addf %2, %5 : vector<1x3x1x256xf32>
    %c0_11 = arith.constant 0 : index
    %c0_12 = arith.constant 0 : index
    %c0_13 = arith.constant 0 : index
    %c0_14 = arith.constant 0 : index
    %7 = vector.load %arg5[%c0_11, %c0_12, %c0_13, %c0_14] : memref<1x3x1x256xf32, #tpu.memory_space<vmem>>, vector<1x3x1x256xf32>
    tpu.vector_store %arg5[%c0_11, %c0_12, %c0_13, %c0_14], %6 {strides = array<i32>} : memref<1x3x1x256xf32, #tpu.memory_space<vmem>>, vector<1x3x1x256xf32>,
    return
  }
  func.func @transform_0(%arg0: i32, %arg1: i32) -> (i32, i32, i32, i32) {
    %c0_i32 = arith.constant 0 : i32
    %c0_i32_0 = arith.constant 0 : i32
    %c0_i32_1 = arith.constant 0 : i32
    return %arg0, %c0_i32, %arg1, %c0_i32_0 : i32, i32, i32, i32
  }
  func.func @transform_1(%arg0: i32, %arg1: i32) -> (i32, i32, i32, i32) {
    %c0_i32 = arith.constant 0 : i32
    %c0_i32_0 = arith.constant 0 : i32
    %c0_i32_1 = arith.constant 0 : i32
    return %arg0, %c0_i32, %arg1, %c0_i32_0 : i32, i32, i32, i32
  }
  func.func @transform_2(%arg0: i32, %arg1: i32) -> (i32, i32, i32, i32) {
    %c0_i32 = arith.constant 0 : i32
    %c0_i32_0 = arith.constant 0 : i32
    %c0_i32_1 = arith.constant 0 : i32
    return %arg0, %c0_i32, %arg1, %c0_i32_0 : i32, i32, i32, i32
  }
  func.func @transform_3(%arg0: i32, %arg1: i32) -> (i32, i32, i32, i32) {
    %c0_i32 = arith.constant 0 : i32
    %c0_i32_0 = arith.constant 0 : i32
    %c0_i32_1 = arith.constant 0 : i32
    return %arg0, %c0_i32, %arg1, %c0_i32_0 : i32, i32, i32, i32
  }
}

</mosaic_0001>

<bundles_post_ra>
// kernel: tpu_custom_call.1
= control target key start
LH: loop header
LB: loop body
LE: loop exit
PB: predicated region body
PF: predicated region fallthrough
CT: control target
= control target key end

     0   :  { %s963_s0 = inlined_call_operand.hbm [shape: f32[2,3,1,256], index: 0, kind: input, shape index: {}]   ;;  %s964_s1 = inlined_call_operand.hbm [shape: f32[2,1,1,256], index: 1, kind: input, shape index: {}]   ;;  %s965_s2 = inlined_call_operand.hbm [shape: f32[2,3,1,256], index: 2, kind: input, shape index: {}]   ;;  %s966_s3 = inlined_call_operand.hbm [shape: f32[2,3,1,256], index: 3, kind: output, shape index: {}]  }
   0x1   :  { %969 = sst [smem:[#allocation14_spill]] %s964_s1 }
   0x2   :  { %8 = vsyncpa [#allocation3], 0 }
   0x3   :  { %10 = vsyncpa [#allocation3 + $0x1], 0 }
   0x4   :  { %11 = vsyncpa [#allocation6], 0 }
   0x5   :  { %13 = vsyncpa [#allocation6 + $0x1], 0 }
   0x6   :  { %14 = vsyncpa [#allocation4], 0 }
   0x7   :  { %16 = vsyncpa [#allocation4 + $0x1], 0  ;;  %s760_s12 = smov 0   ;;  %s762_s13 = smov 0  }
   0x8   :  { %s764_s14 = smov 0   ;;  %s766_s15 = smov 0  }
   0x9   :  { %s768_s16 = smov 0   ;;  %s770_s17 = smov 0  }
   0xa LB: > { %970 = sst [smem:[#allocation12_spill]] %s726_s16  ;;  %s791_s18 = sadd.s32 4294967295, %s730_s17   ;;  %s730_s17 = sphi %s770_s17, %s22_s17   ;;  %s726_s16 = sphi %s768_s16, %s983_s16   ;;  %s722_s15 = sphi %s766_s15, %s982_s15   ;;  %s718_s14 = sphi %s764_s14, %s986_s14   ;;  %s714_s13 = sphi %s762_s13, %s985_s13   ;;  %s710_s12 = sphi %s760_s12, %s984_s12  }
   0xb   : > { %s466_s19 = sadd.s32 4294967294, %s730_s17   ;;  %s34_s20 = sadd.s32 1, %s726_s16 }
   0xc   : > { %s43_s21 = sadd.s32 1, %s718_s14  ;;  %p36_p0 = scmp.ge.s32.totalorder %s34_s20, 2 }
   0xd   : > { %p50_p1 = scmp.ne.s32.totalorder %s718_s14, %s714_s13  ;;  %p51_p2 = scmp.eq.s32.totalorder %s730_s17, 0 }
   0xe   : > { %p56_p3 = scmp.ne.s32.totalorder %s714_s13, %s710_s12  ;;  %s988_s20 = smov (%p36_p0, %s34_s20), 0 }
   0xf   : > { %971 = sst [smem:[#allocation13_spill]] %s988_s20  ;;  %p803_p4 = por %p51_p2, %p50_p1 }
  0x10   : > { %p57_p5 = scmp.eq.s32.totalorder %s791_s18, 0  ;;  %s38_s23 = ssub.s32 %s726_s16, %s988_s20 }
  0x11   : > { %p138_p6 = scmp.eq.s32.totalorder %s791_s18, 1  ;;  %p41_p7 = scmp.eq.s32.totalorder %s38_s23, 0 }
  0x12   : > { %p811_p8 = por %p57_p5, %p56_p3  ;;  %p144_p10 = scmp.eq.s32.totalorder %s466_s19, 1 }
  0x13   : > { %p815_p9 = por %p138_p6, %p50_p1  ;;  %p508_p13 = scmp.lt.s32.totalorder %s730_s17, 2 }
  0x14   : > { %s820_s26 = scalar_select %p41_p7, %s718_s14, %s43_s21  }
  0x15   : > { %p822_p11 = por %p144_p10, %p56_p3  ;;  %s829_s28 = sand.u32 1, %s718_s14  }
  0x16   : > { %s187_s30 = sand.u32 1, %s730_s17   ;;  %p835_p0 = pnand %p508_p13, %p803_p4 }
  0x17   : > { %s470_s5 = sshll.u32 %s829_s28, 1  ;;  %s479_s6 = sshll.u32 %s726_s16, 5 }
  0x18   : > { %s977_s1 = sld [smem:[#allocation14_spill]]  ;;  %s191_s10 = scalar_lea.vmem [#allocation5], %s470_s5 }
  0x19   : > { %s201_s11 = sshll.u32 %s191_s10, 4  ;;  %s844_s19 = scalar_lea.sflag [#allocation6], %s187_s30  ;;  %s202_s11 = int_to_ptr.vmem [resolvable:$true] %s201_s11 }
  0x1a   : > { %p564_p1 = pneg %p835_p0  ;;  %s575_s21 = scalar_lea.vmem %s202_s11, 32 }
  0x1b   : > { %p576_p2 = scmp.ne.s32.totalorder %s202_s11, %s575_s21  ;;  %s732_s22 = smov [#allocation5]  }
  0x1c   : > { %s580_s23 = sshll.u32 %s732_s22, 4  ;;  %s581_s23 = int_to_ptr.vmem [resolvable:$false] %s580_s23 }
  0x1d   : > { %p578_p3 = pnand %p576_p2, %p564_p1  ;;  %s582_s29 = scalar_lea.vmem %s581_s23, 64 }
  0x1e   : > { %s199_s9 = scalar_lea.hbm %s977_s1, %s479_s6  ;;  %p583_p5 = scmp.lt.s32.totalorder %s202_s11, %s581_s23 }
  0x1f   : > { %p579_p4 = pneg %p578_p3  ;;  %p584_p6 = scmp.lt.s32.totalorder %s582_s29, %s575_s21 }
  0x21   : > { %p585_p7 = por %p584_p6, %p583_p5 }
  0x23   : > { %p586_p10 = pnand %p585_p7, %p579_p4 }
  0x25   : > { %589 = shalt.err (!%p586_p10)
}
  0x26   : > { %500 = dma.hbm_to_vmem [thread:$0]  (!%p835_p0), %s199_s9, 32, %s202_s11, %s844_s19  }
  0x27   : > { %s978_s30 = smul.u32 6, %s829_s28  ;;  %p474_p13 = scmp.ge.s32.totalorder %s730_s17, 1 }
  0x28   : > { %p229_p2 = scmp.lt.s32.totalorder %s730_s17, 3  ;;  %s481_s7 = smul.u32 96, %s726_s16 }
  0x29   : > { %s212_s5 = scalar_lea.vmem [#allocation7], %s978_s30  ;;  %s980_s8 = smov %s978_s30 }
  0x2a   : > { %s221_s6 = sshll.u32 %s212_s5, 4  ;;  %p860_p3 = pnand %p474_p13, %p229_p2  ;;  %s857_s6 = int_to_ptr.vmem [resolvable:$true] %s221_s6 }
  0x2b   : > { %s168_s10 = scalar_lea.vmem [#allocation2], %s980_s8  ;;  %s176_s9 = scalar_lea.hbm %s963_s0, %s481_s7 }
  0x2c   : > { %s177_s21 = sshll.u32 %s168_s10, 4  ;;  %s873_s5 = scalar_lea.hbm %s965_s2, %s481_s7  ;;  %s178_s21 = int_to_ptr.vmem [resolvable:$true] %s177_s21 }
  0x2d   : > { %s165_s1 = scalar_lea.sflag [#allocation3], %s829_s28  ;;  %s603_s20 = scalar_lea.vmem %s178_s21, 96 }
  0x2e   : > { %p604_p4 = scmp.ne.s32.totalorder %s178_s21, %s603_s20  ;;  %s733_s16 = smov [#allocation2]  }
  0x2f   : > { %s608_s8 = sshll.u32 %s733_s16, 4  ;;  %s609_s8 = int_to_ptr.vmem [resolvable:$false] %s608_s8 }
  0x30   : > { %p606_p5 = pnand %p604_p4, %p564_p1  ;;  %s610_s10 = scalar_lea.vmem %s609_s8, 192 }
  0x31   : > { %p611_p7 = scmp.lt.s32.totalorder %s178_s21, %s609_s8  ;;  %p612_p10 = scmp.lt.s32.totalorder %s610_s10, %s603_s20 }
  0x32   : > { %p607_p6 = pneg %p606_p5 }
  0x33   : > { %p613_p13 = por %p612_p10, %p611_p7 }
  0x35   : > { %p614_p2 = pnand %p613_p13, %p607_p6 }
  0x37   : > { %617 = shalt.err (!%p614_p2)
}
  0x38   : > { %s734_s22 = smov 32   ;;  %s735_s28 = smov 2  }
  0x39   : > { %497 = dma.hbm_to_vmem [thread:$0]  (!%p835_p0), %s176_s9, 96, %s178_s21, %s165_s1, %s734_s22, %s734_s22, %s735_s28  }
  0x3a   : > { %s631_s7 = scalar_lea.vmem %s857_s6, 96  ;;  %s736_s16 = smov [#allocation7]  }
  0x3b   : > { %p632_p4 = scmp.ne.s32.totalorder %s857_s6, %s631_s7  ;;  %s636_s20 = sshll.u32 %s736_s16, 4  ;;  %s637_s20 = int_to_ptr.vmem [resolvable:$false] %s636_s20 }
  0x3c   : > { %s638_s23 = scalar_lea.vmem %s637_s20, 192  ;;  %p639_p6 = scmp.lt.s32.totalorder %s857_s6, %s637_s20 }
  0x3d   : > { %p634_p5 = pnand %p632_p4, %p564_p1  ;;  %p640_p7 = scmp.lt.s32.totalorder %s638_s23, %s631_s7 }
  0x3f   : > { %p635_p12 = pneg %p634_p5  ;;  %p641_p10 = por %p640_p7, %p639_p6 }
  0x41   : > { %p642_p13 = pnand %p641_p10, %p635_p12 }
  0x43   : > { %645 = shalt.err (!%p642_p13)
}
  0x44   : > { %503 = dma.hbm_to_vmem [thread:$0]  (!%p835_p0), %s873_s5, 96, %s857_s6, %s844_s19, %s734_s22, %s734_s22, %s735_s28  }
  0x45   : > { %233 = sbr.rel (%p860_p3) target bundleno = 105 (0x69), region = 32  ;;  %s895_s1 = sand.u32 (!%p860_p3), 1, %s714_s13  }
  0x46   : > { %s484_s21 = smul.u32 (!%p860_p3), 6, %s895_s1  ;;  %s236_s9 = scalar_lea.sflag (!%p860_p3), [#allocation3], %s895_s1 }
  0x48   : > { %s239_s11 = scalar_lea.vmem (!%p860_p3), [#allocation2], %s484_s21 }
  0x4a   : > { %697 = dma.done.wait (%p811_p8), %s236_s9, 96  }
  0x4b   : > { %699 = vsyncadd (%p811_p8), %s236_s9, 4294967200  ;;  %s244_s4 = sand.u32 1, %s791_s18   ;;  %s475_s19 = sshll.u32 %s895_s1, 1 }
  0x4c   : > { %s245_s6 = scalar_lea.sflag [#allocation6], %s244_s4  ;;  %s248_s29 = scalar_lea.vmem [#allocation5], %s475_s19 }
  0x4d   : > { %701 = dma.done.wait (%p811_p8), %s245_s6, 128  }
  0x4e   : > { %703 = vsyncadd (%p811_p8), %s245_s6, 4294967168  ;;  %v290_v0 = vld [vmem:[%s239_s11] sm:$0x3]  ;;  %v293_v1 = vld [vmem:[%s248_s29] sm:$0x3]  ;;  %s257_s30 = scalar_lea.vmem [#allocation7], %s484_s21  ;;  %v306_v3 = vlaneseq }
  0x4f   : > { %v294_v2 = vld [vmem:[%s257_s30] sm:$0x3]  ;;  %v291_v5 = vld [vmem:[%s239_s11 + $0x2] sm:$0x3]  ;;  %v295_v6 = vld [vmem:[%s257_s30 + $0x2] sm:$0x3] }
  0x50   : > { %v297_v4 = vsub.f32 %v290_v0, %v294_v2  ;;  %v292_v7 = vld [vmem:[%s239_s11 + $0x4] sm:$0x3]  ;;  %v298_v8 = vsub.f32 %v291_v5, %v295_v6  ;;  %v296_v9 = vld [vmem:[%s257_s30 + $0x4] sm:$0x3]  ;;  %s289_s18 = scalar_lea.vmem [#allocation8], %s484_s21  ;;  %s485_s24 = smul.u32 96, %s722_s15 }
  0x51   : > { %s329_s5 = sshll.u32 %s289_s18, 4  ;;  %v299_v11 = vsub.f32 %v292_v7, %v296_v9  ;;  %vm308_vm0 = vcmp.lt.s32.totalorder %v306_v3, 256  ;;  %s314_s15 = scalar_lea.sflag [#allocation4], %s895_s1  ;;  %s910_s5 = int_to_ptr.vmem [resolvable:$true] %s329_s5 }
  0x52   : > { %v300_v10 = vmul.f32 %v297_v4, %v293_v1  ;;  %v301_v12 = vmul.f32 %v298_v8, %v293_v1  ;;  %s915_s22 = scalar_lea.hbm %s966_s3, %s485_s24  ;;  %s646_s28 = scalar_lea.vmem %s910_s5, 96 }
  0x53   : > { %v302_v14 = vmul.f32 %v299_v11, %v293_v1  ;;  %p647_p8 = scmp.ne.s32.totalorder %s910_s5, %s646_s28  ;;  %s737_s7 = smov [#allocation8]  }
  0x54   : > { %v303_v13 = vadd.f32 %v300_v10, %v294_v2  ;;  %v304_v15 = vadd.f32 %v301_v12, %v295_v6  ;;  %s650_s16 = sshll.u32 %s737_s7, 4  ;;  %s651_s16 = int_to_ptr.vmem [resolvable:$false] %s650_s16 }
  0x55   : > { %v305_v16 = vadd.f32 %v302_v14, %v296_v9  ;;  %p648_p12 = pnand %p647_p8, %p815_p9  ;;  %s652_s20 = scalar_lea.vmem %s651_s16, 192 }
  0x56   : > { %310 = vst.msk [vmem:[%s289_s18] sm:$0x3] %vm308_vm0, %v303_v13  ;;  %311 = vst.msk [vmem:[%s289_s18 + $0x2] sm:$0x3] %vm308_vm0, %v304_v15  ;;  %p653_p1 = scmp.lt.s32.totalorder %s910_s5, %s651_s16  ;;  %p654_p3 = scmp.lt.s32.totalorder %s652_s20, %s646_s28 }
  0x57   : > { %312 = vst.msk [vmem:[%s289_s18 + $0x4] sm:$0x3] %vm308_vm0, %v305_v16  ;;  %p649_p0 = pneg %p648_p12 }
  0x58   : > { %p655_p2 = por %p654_p3, %p653_p1 }
  0x5a   : > { %p656_p4 = pnand %p655_p2, %p649_p0 }
  0x5c   : > { %659 = shalt.err (!%p656_p4)
}
  0x5d   : > { %s660_s23 = scalar_lea.hbm %s915_s22, 96  ;;  %s664_s11 = scalar_lea.hbm %s966_s3, 192 }
  0x5e   : > { %p661_p5 = scmp.ne.s32.totalorder %s915_s22, %s660_s23  ;;  %p665_p10 = scmp.lt.s32.totalorder %s915_s22, %s966_s3 }
  0x5f   : > { %p666_p13 = scmp.lt.s32.totalorder %s664_s11, %s660_s23 }
  0x60   : > { %p662_p6 = pnand %p661_p5, %p815_p9 }
  0x61   : > { %p667_p8 = por %p666_p13, %p665_p10 }
  0x62   : > { %p663_p7 = pneg %p662_p6 }
  0x64   : > { %p668_p12 = pnand %p667_p8, %p663_p7 }
  0x66   : > { %671 = shalt.err (!%p668_p12)
}
  0x67   : > { %s738_s6 = smov 32   ;;  %s739_s29 = smov 2  }
  0x68   : > { %492 = dma.vmem_to_hbm [thread:$0]  (%p815_p9), %s910_s5, 96, %s915_s22, %s314_s15, %s738_s6, %s738_s6, %s739_s29  }
  0x69 PF: > { %s344_s30 = sand.u32 1, %s710_s12   ;;  %p981_p0 = scmp.ge.s32.totalorder %s730_s17, 2 }
  0x6a   : > { %s345_s18 = scalar_lea.sflag [#allocation4], %s344_s30 }
  0x6b   : > { %p505_p1 = pnand %p981_p0, %p822_p11 }
  0x6d   : > { %p506_p3 = pneg %p505_p1 }
  0x6f   : > { %705 = dma.done.wait (%p506_p3), %s345_s18, 96  }
  0x70   : > { %707 = vsyncadd (%p506_p3), %s345_s18, 4294967200  ;;  %s22_s17 = sadd.s32 1, %s730_s17   ;;  %s982_s15 = sld [smem:[#allocation12_spill]] }
  0x71   : > { %p19_p2 = scmp.ge.s32.totalorder %s22_s17, 4   ;;  %s983_s16 = sld [smem:[#allocation13_spill]] }
  0x72   : > { %s984_s12 = smov %s714_s13  ;;  %s985_s13 = smov %s718_s14 }
  0x73   : > { %s986_s14 = smov %s820_s26  ;;  %21 = sbr.rel (!%p19_p2) target bundleno = 10 (0xa), region = 101 }
  0x78   :  { %350 = vsyncpa [#allocation3], 1 }
  0x79   :  { %352 = vsyncpa [#allocation3 + $0x1], 1 }
  0x7a   :  { %353 = vsyncpa [#allocation6], 1 }
  0x7b   :  { %355 = vsyncpa [#allocation6 + $0x1], 1 }
  0x7c   :  { %356 = vsyncpa [#allocation4], 1 }
  0x7d   :  { %358 = vsyncpa [#allocation4 + $0x1], 1 }

</bundles_post_ra>
